<compile_context>
chip_gen: v5e
topology: v5e:2x2
jax: 0.10.0
libtpu: 0.0.40
codegen_flags: <defaults>
</compile_context>

<pallas_src>
import jax
import jax.numpy as jnp
from jax import lax
from jax.experimental import pallas as pl
from jax.experimental.pallas import tpu as pltpu


def _random_classifier_kernel(seed_ref, w_ref, o_ref):
    """seed_ref: SMEM (1,) int32; w_ref: SMEM (2,2) f32 (torch (out,in) weight);
    o_ref: VMEM (2, TILE_B) f32 = out^T block (classes on sublanes, batch on lanes)."""
    tb = o_ref.shape[1]
    tile = pl.program_id(0)

    # ---- Bernoulli(0.5) prediction per batch element (counter-based hash) ----
    lane = lax.broadcasted_iota(jnp.int32, (2, tb), 1).astype(jnp.uint32)  # same in both rows
    base = (tile * tb).astype(jnp.uint32)
    s = seed_ref[0].astype(jnp.uint32)
    x = (base + lane) * jnp.uint32(0x9E3779B1) \
        + s * jnp.uint32(0x85EBCA77) + jnp.uint32(0x27220A95)
    x = (x ^ (x >> 16)) * jnp.uint32(0x7FEB352D)
    x = (x ^ (x >> 15)) * jnp.uint32(0x846CA68B)
    x = x ^ (x >> 16)
    pred_is_one = (x & jnp.uint32(1)) == jnp.uint32(1)        # (2, tb) bool, identical rows

    # ---- one_hot @ W^T collapses to a column-select of W (pure VPU) ----------
    # out[b, c] = W[c, pred[b]]  =>  out^T[c, b] = pred[b] ? W[c, 1] : W[c, 0]
    row = lax.broadcasted_iota(jnp.int32, (2, tb), 0)
    col0 = jnp.where(row == 0, w_ref[0, 0], w_ref[1, 0])      # W[:, 0] broadcast over lanes
    col1 = jnp.where(row == 0, w_ref[0, 1], w_ref[1, 1])      # W[:, 1] broadcast over lanes
    o_ref[...] = jnp.where(pred_is_one, col1, col0)


def _round_up(x, m):
    return ((x + m - 1) // m) * m


def random_classifier_forward(input_ids, attention_mask, weight, seed=0):
    """weight: (2, 2) = nn.Linear(2, 2, bias=False).weight (out, in) layout.
    Returns (batch, 2) float32; each row is a Bernoulli(0.5)-selected column of W."""
    del attention_mask  # reference forward only uses input_ids.shape[0]
    B = int(input_ids.shape[0])

    LANES = 128
    MAX_TILE_B = 64 * 1024                       # 2*TILE_B*4B = 512 KiB/block -> fits v5e/v6e/v7x VMEM
    tile_b = min(MAX_TILE_B, _round_up(B, LANES))
    num_tiles = pl.cdiv(B, tile_b)
    b_pad = num_tiles * tile_b

    seed_arr = jnp.asarray([seed], dtype=jnp.int32)
    w = jnp.asarray(weight, dtype=jnp.float32)   # untransposed; kernel reads 4 SMEM scalars

    out_t = pl.pallas_call(
        _random_classifier_kernel,
        out_shape=jax.ShapeDtypeStruct((2, b_pad), jnp.float32),
        grid=(num_tiles,),
        in_specs=[
            pl.BlockSpec(memory_space=pltpu.MemorySpace.SMEM),   # seed scalar
            pl.BlockSpec(memory_space=pltpu.MemorySpace.SMEM),   # weight (2, 2)
        ],
        out_specs=pl.BlockSpec((2, tile_b), lambda i: (0, i)),   # lane-dense output blocks
        compiler_params=pltpu.CompilerParams(
            dimension_semantics=("parallel",)),                  # megacore sharding on v7x
    )(seed_arr, w)

    # glue: lane-dense (2, B_pad) -> (B, 2) to match the torch output layout
    return out_t.T[:B, :]


if __name__ == "__main__":
    key = jax.random.PRNGKey(0)
    k_w, k_ids = jax.random.split(key)

    # nn.Linear(2, 2, bias=False) default init: U(-1/sqrt(in), 1/sqrt(in))
    bound = 1.0 / (2.0 ** 0.5)
    weight = jax.random.uniform(k_w, (2, 2), jnp.float32, -bound, bound)

    # Small example inputs consistent with the forward signature.
    batch, seq = 2, 8
    input_ids = jax.random.randint(k_ids, (batch, seq), 0, 1000, dtype=jnp.int32)
    attention_mask = jnp.ones((batch, seq), dtype=jnp.int32)

    out = random_classifier_forward(input_ids, attention_mask, weight, seed=0)
    out = jax.block_until_ready(out)

    assert out.shape == (batch, 2) and out.dtype == jnp.float32
    # Each output row must equal one of the two columns of W (== fc1(e_p)).
    w_host = jax.device_get(weight)
    o_host = jax.device_get(out)
    for b in range(batch):
        ok0 = bool(jnp.allclose(o_host[b], w_host[:, 0]))
        ok1 = bool(jnp.allclose(o_host[b], w_host[:, 1]))
        assert ok0 or ok1
    print("KERNEL_OK")
</pallas_src>

<mosaic_0001>
module attributes {stable_mosaic.version = 11 : i64} {
  func.func @_random_classifier_kernel(%arg0: i32, %arg1: memref<1xi32, #tpu.memory_space<smem>>, %arg2: memref<2x2xf32, #tpu.memory_space<smem>>, %arg3: memref<2x128xf32, #tpu.memory_space<vmem>>) attributes {dimension_semantics = [#tpu.dimension_semantics<parallel>], iteration_bounds = array<i64: 1>, scalar_prefetch = 0 : i64, scratch_operands = 0 : i64, tpu.core_type = #tpu.core_type<tc>, window_params = [{transform_indices = @transform_0, window_bounds = array<i64: 1>}, {transform_indices = @transform_1, window_bounds = array<i64: 2, 2>}, {transform_indices = @transform_2, window_bounds = array<i64: 2, 128>}]} {
    %0 = tpu.iota {dimensions = array<i32: 1>} : vector<2x128xi32>
    %c128_i32 = arith.constant 128 : i32
    %1 = arith.muli %arg0, %c128_i32 : i32
    %c0 = arith.constant 0 : index
    %2 = memref.load %arg1[%c0] : memref<1xi32, #tpu.memory_space<smem>>
    %3 = vector.broadcast %1 : i32 to vector<2x128xi32>
    %4 = arith.addi %3, %0 : vector<2x128xi32>
    %c-1640531535_i32 = arith.constant -1640531535 : i32
    %5 = vector.broadcast %c-1640531535_i32 : i32 to vector<2x128xi32>
    %6 = arith.muli %4, %5 : vector<2x128xi32>
    %c-2048144777_i32 = arith.constant -2048144777 : i32
    %7 = arith.muli %2, %c-2048144777_i32 : i32
    %8 = vector.broadcast %7 : i32 to vector<2x128xi32>
    %9 = arith.addi %6, %8 : vector<2x128xi32>
    %c656542357_i32 = arith.constant 656542357 : i32
    %10 = vector.broadcast %c656542357_i32 : i32 to vector<2x128xi32>
    %11 = arith.addi %9, %10 : vector<2x128xi32>
    %c16_i32 = arith.constant 16 : i32
    %12 = vector.broadcast %c16_i32 : i32 to vector<2x128xi32>
    %13 = arith.shrui %11, %12 : vector<2x128xi32>
    %14 = arith.xori %11, %13 : vector<2x128xi32>
    %c2146121005_i32 = arith.constant 2146121005 : i32
    %15 = vector.broadcast %c2146121005_i32 : i32 to vector<2x128xi32>
    %16 = arith.muli %14, %15 : vector<2x128xi32>
    %c15_i32 = arith.constant 15 : i32
    %17 = vector.broadcast %c15_i32 : i32 to vector<2x128xi32>
    %18 = arith.shrui %16, %17 : vector<2x128xi32>
    %19 = arith.xori %16, %18 : vector<2x128xi32>
    %c-2073254261_i32 = arith.constant -2073254261 : i32
    %20 = vector.broadcast %c-2073254261_i32 : i32 to vector<2x128xi32>
    %21 = arith.muli %19, %20 : vector<2x128xi32>
    %c16_i32_0 = arith.constant 16 : i32
    %22 = vector.broadcast %c16_i32_0 : i32 to vector<2x128xi32>
    %23 = arith.shrui %21, %22 : vector<2x128xi32>
    %24 = arith.xori %21, %23 : vector<2x128xi32>
    %c1_i32 = arith.constant 1 : i32
    %25 = vector.broadcast %c1_i32 : i32 to vector<2x128xi32>
    %26 = arith.andi %24, %25 : vector<2x128xi32>
    %c1_i32_1 = arith.constant 1 : i32
    %27 = vector.broadcast %c1_i32_1 : i32 to vector<2x128xi32>
    %28 = arith.cmpi eq, %26, %27 : vector<2x128xi32>
    %29 = tpu.iota {dimensions = array<i32: 0>} : vector<2x128xi32>
    %c0_i32 = arith.constant 0 : i32
    %30 = vector.broadcast %c0_i32 : i32 to vector<2x128xi32>
    %31 = arith.cmpi eq, %29, %30 : vector<2x128xi32>
    %c0_2 = arith.constant 0 : index
    %c0_3 = arith.constant 0 : index
    %32 = memref.load %arg2[%c0_2, %c0_3] : memref<2x2xf32, #tpu.memory_space<smem>>
    %c1 = arith.constant 1 : index
    %c0_4 = arith.constant 0 : index
    %33 = memref.load %arg2[%c1, %c0_4] : memref<2x2xf32, #tpu.memory_space<smem>>
    %34 = vector.broadcast %32 : f32 to vector<2x128xf32>
    %35 = vector.broadcast %33 : f32 to vector<2x128xf32>
    %36 = arith.select %31, %34, %35 : vector<2x128xi1>, vector<2x128xf32>
    %c0_i32_5 = arith.constant 0 : i32
    %37 = vector.broadcast %c0_i32_5 : i32 to vector<2x128xi32>
    %38 = arith.cmpi eq, %29, %37 : vector<2x128xi32>
    %c0_6 = arith.constant 0 : index
    %c1_7 = arith.constant 1 : index
    %39 = memref.load %arg2[%c0_6, %c1_7] : memref<2x2xf32, #tpu.memory_space<smem>>
    %c1_8 = arith.constant 1 : index
    %c1_9 = arith.constant 1 : index
    %40 = memref.load %arg2[%c1_8, %c1_9] : memref<2x2xf32, #tpu.memory_space<smem>>
    %41 = vector.broadcast %39 : f32 to vector<2x128xf32>
    %42 = vector.broadcast %40 : f32 to vector<2x128xf32>
    %43 = arith.select %38, %41, %42 : vector<2x128xi1>, vector<2x128xf32>
    %44 = arith.select %28, %43, %36 : vector<2x128xi1>, vector<2x128xf32>
    %c0_10 = arith.constant 0 : index
    %c0_11 = arith.constant 0 : index
    %45 = vector.load %arg3[%c0_10, %c0_11] : memref<2x128xf32, #tpu.memory_space<vmem>>, vector<2x128xf32>
    tpu.vector_store %arg3[%c0_10, %c0_11], %44 {strides = array<i32>} : memref<2x128xf32, #tpu.memory_space<vmem>>, vector<2x128xf32>,
    return
  }
  func.func @transform_0(%arg0: i32) -> i32 {
    %c0_i32 = arith.constant 0 : i32
    %c0_i32_0 = arith.constant 0 : i32
    return %c0_i32 : i32
  }
  func.func @transform_1(%arg0: i32) -> (i32, i32) {
    %c0_i32 = arith.constant 0 : i32
    %c0_i32_0 = arith.constant 0 : i32
    %c0_i32_1 = arith.constant 0 : i32
    return %c0_i32, %c0_i32_0 : i32, i32
  }
  func.func @transform_2(%arg0: i32) -> (i32, i32) {
    %c0_i32 = arith.constant 0 : i32
    %c0_i32_0 = arith.constant 0 : i32
    return %c0_i32, %arg0 : i32, i32
  }
}

</mosaic_0001>

<bundles_post_ra>
// kernel: tpu_custom_call.1
= control target key start
LH: loop header
LB: loop body
LE: loop exit
PB: predicated region body
PF: predicated region fallthrough
CT: control target
= control target key end

     0   :  { %8 = vsyncpa [#allocation5], 0  ;;  %s150_s0 = inlined_call_operand.<no memory space> [shape: s32[1], index: 0, kind: input, shape index: {}]   ;;  %s151_s1 = inlined_call_operand.vmem [shape: f32[2,2], index: 1, kind: input, shape index: {}]   ;;  %s152_s2 = inlined_call_operand.hbm [shape: f32[2,128], index: 2, kind: output, shape index: {}]  }
   0x1   :  { %9 = vsyncpa [#allocation4], 0  ;;  %s17_s11 = sshll.u32 %s151_s1, 4  ;;  %s124_s12 = smov [#allocation3]   ;;  %s18_s11 = int_to_ptr.vmem [resolvable:$true] %s17_s11 }
   0x2   :  { %20 = dma.vmem_to_smem %s18_s11, 32, %s124_s12, [#allocation5]  }
   0x3   :  { %120 = dma.done.wait [#allocation5], 32  }
   0x4   :  { %121 = vsyncadd [#allocation5], 4294967264 }
   0x5   :  { %25 = sfence }
   0x6   :  { %v26_v0 = vlaneseq  ;;  %s33_s15 = smul.u32 2246822519, %s150_s0  ;;  %s50_s16 = sld [smem:[#allocation3]] }
   0x7   :  { %s79_s1 = sld [smem:[#allocation3 + $0x80]]  ;;  %s125_s0 = smov [#allocation6]  }
   0x8   :  { %v27_v1 = vand.u32 127, %v26_v0  ;;  %v34_v2 = vstv %s33_s15  ;;  %s80_s17 = sld [smem:[#allocation3 + $0x1]]  ;;  %v48_v11 = vshrl.u32 %v26_v0, 7  ;;  %s67_s19 = sshll.u32 %s125_s0, 4  ;;  %s68_s19 = int_to_ptr.vmem [resolvable:$true] %s67_s19 }
   0x9   :  { %s81_s18 = sld [smem:[#allocation3 + $0x81]]  ;;  %s69_s22 = sshll.u32 %s152_s2, 4  ;;  %s70_s22 = int_to_ptr.hbm [resolvable:$true] %s69_s22 }
   0xa   :  { %v32_v3 = vmul.u32 2654435761, %v27_v1  ;;  %vm49_vm0 = vcmp.eq.s32.totalorder %v48_v11, 0 }
   0xc   :  { %v35_v4 = vadd.s32 %v34_v2, %v32_v3  ;;  %v52_v14 = vstv %s50_s16 }
   0xd   :  { %v53_v15 = vstv %s79_s1 }
   0xe   :  { %v36_v5 = vadd.s32 656542357, %v35_v4  ;;  %v57_v16 = vstv %s80_s17  ;;  %v54_v20 = vsel %vm49_vm0, %v52_v14, %v53_v15 }
   0xf   :  { %v58_v17 = vstv %s81_s18 }
  0x10   :  { %v37_v6 = vshrl.u32 %v36_v5, 16  ;;  %v59_v21 = vsel %vm49_vm0, %v57_v16, %v58_v17 }
  0x12   :  { %v38_v7 = vxor.u32 %v37_v6, %v36_v5 }
  0x14   :  { %v39_v8 = vmul.u32 2146121005, %v38_v7 }
  0x16   :  { %v40_v9 = vshrl.u32 %v39_v8, 15 }
  0x18   :  { %v41_v10 = vxor.u32 %v40_v9, %v39_v8 }
  0x1a   :  { %v42_v12 = vmul.u32 2221713035, %v41_v10 }
  0x1c   :  { %v43_v13 = vshrl.u32 %v42_v12, 16 }
  0x1e   :  { %v44_v18 = vxor.u32 %v43_v13, %v42_v12 }
  0x20   :  { %v45_v19 = vand.u32 1, %v44_v18 }
  0x22   :  { %vm46_vm1 = vcmp.eq.s32.totalorder %v45_v19, 1 }
  0x23   :  { %v60_v22 = vsel %vm46_vm1, %v59_v21, %v54_v20 }
  0x24   :  { %61 = vst [vmem:[#allocation6] sm:$0x3] %v60_v22 }
  0x25   :  { %72 = dma.vmem_to_hbm [thread:$0]  %s68_s19, 32, %s70_s22, [#allocation4]  }
  0x26   :  { %122 = dma.done.wait [#allocation4], 32  }
  0x27   :  { %123 = vsyncadd [#allocation4], 4294967264 }
  0x28   :  { %77 = vsyncpa [#allocation4], 1 }
  0x29   :  { %78 = vsyncpa [#allocation5], 1 }

</bundles_post_ra>
